<compile_context>
chip_gen: v7x
topology: tpu7x:2x2x1
jax: 0.10.0
libtpu: 0.0.40
codegen_flags: <defaults>
</compile_context>

<pallas_src>
import jax
import jax.numpy as jnp
from jax.experimental import pallas as pl
from jax.experimental.pallas import tpu as pltpu

EPS = 1e-5  # PyTorch nn.LayerNorm default


def _round_up(x, m):
    return ((x + m - 1) // m) * m


def _default_row_tile():
    """Generation-aware row-tile: smaller on v7x (64 MiB VMEM), larger on v5e/v6e."""
    try:
        vmem = pltpu.get_tpu_info().vmem_capacity_bytes
    except Exception:  # info not available (e.g. interpret mode) -> conservative
        vmem = 64 * 1024 * 1024
    return 256 if vmem <= 64 * 1024 * 1024 else 512


def prenorm_linear_kernel(x_ref, gamma_ref, beta_ref, w_ref, b_ref, o_ref):
    # x_ref: (TM, D)   gamma/beta: (1, D)   w: (D, Dout)   b: (1, Dout)
    x = x_ref[...].astype(jnp.float32)

    # LayerNorm over last dim (biased variance, like PyTorch), f32 math.
    mean = jnp.mean(x, axis=-1, keepdims=True)
    centered = x - mean
    var = jnp.mean(centered * centered, axis=-1, keepdims=True)
    inv = jax.lax.rsqrt(var + EPS)
    y = (centered * inv) * gamma_ref[...].astype(jnp.float32) \
        + beta_ref[...].astype(jnp.float32)

    # fn = Linear(D -> Dout): feed MXU in the weight dtype (bf16 when weights
    # are bf16 -> full MXU throughput), accumulate in f32.
    y = y.astype(w_ref.dtype)
    out = jnp.dot(y, w_ref[...], preferred_element_type=jnp.float32)
    out = out + b_ref[...].astype(jnp.float32)
    o_ref[...] = out.astype(o_ref.dtype)


def prenorm_linear(x, gamma, beta, w, b, *, tm=None):
    """x: (B, N, D). Returns fn(LayerNorm(x)) with fn = Linear(D -> Dout)."""
    B, N, D = x.shape
    Dout = w.shape[1]
    M = B * N

    x2 = x.reshape(M, D)
    gamma2 = gamma.reshape(1, D)
    beta2 = beta.reshape(1, D)
    b2 = b.reshape(1, Dout)

    # ---- row-tile selection -------------------------------------------------
    if tm is None:
        tm = _default_row_tile()
    # tile must be a multiple of 8 (sublane) and no larger than padded M
    tm = max(8, min(_round_up(tm, 8), _round_up(M, 8)))
    tm = _round_up(tm, 8)
    m_pad = _round_up(M, tm)
    if m_pad != M:
        x2 = jnp.pad(x2, ((0, m_pad - M), (0, 0)))
    grid_m = m_pad // tm

    # ---- VMEM budget hint (only when per-step footprint is large) -----------
    item = x2.dtype.itemsize
    est = (2 * tm * D * item          # x tile, double-buffered
           + 2 * tm * Dout * item     # out tile, double-buffered
           + D * Dout * w.dtype.itemsize  # resident W
           + (2 * D + Dout) * 4)      # gamma/beta/bias
    compiler_kwargs = dict(dimension_semantics=("parallel",))
    if est > 16 * 1024 * 1024:
        compiler_kwargs["vmem_limit_bytes"] = int(min(2 * est, 60 * 1024 * 1024))

    out = pl.pallas_call(
        prenorm_linear_kernel,
        out_shape=jax.ShapeDtypeStruct((m_pad, Dout), x.dtype),
        grid_spec=pltpu.PrefetchScalarGridSpec(
            num_scalar_prefetch=0,
            grid=(grid_m,),
            in_specs=[
                pl.BlockSpec((tm, D), lambda i: (i, 0)),     # x: tiled over rows
                pl.BlockSpec((1, D), lambda i: (0, 0)),      # gamma: resident
                pl.BlockSpec((1, D), lambda i: (0, 0)),      # beta: resident
                pl.BlockSpec((D, Dout), lambda i: (0, 0)),   # W: resident
                pl.BlockSpec((1, Dout), lambda i: (0, 0)),   # bias: resident
            ],
            out_specs=pl.BlockSpec((tm, Dout), lambda i: (i, 0)),
        ),
        compiler_params=pltpu.CompilerParams(**compiler_kwargs),
    )(x2, gamma2, beta2, w, b2)

    return out[:M].reshape(B, N, Dout)
    # TODO(synk): if D grows large (fused MLP), add a K reduction grid axis
    # with an f32 VMEM accumulator (pl.when init/finalize) to bound the
    # per-step W slice on v7x's 64 MiB VMEM.


def reference(x, gamma, beta, w, b):
    xf = x.astype(jnp.float32)
    mean = jnp.mean(xf, axis=-1, keepdims=True)
    var = jnp.mean((xf - mean) ** 2, axis=-1, keepdims=True)
    xn = (xf - mean) / jnp.sqrt(var + EPS)
    y = xn * gamma.astype(jnp.float32) + beta.astype(jnp.float32)
    out = y @ w.astype(jnp.float32) + b.astype(jnp.float32)
    return out.astype(x.dtype)


if __name__ == "__main__":
    # Small but lane-aligned shapes (D, Dout multiples of 128).
    B, N, D, DOUT = 2, 72, 128, 128   # M = 144 rows

    key = jax.random.PRNGKey(0)
    kx, kw, kb = jax.random.split(key, 3)

    x = jax.random.normal(kx, (B, N, D), dtype=jnp.float32)

    # Deterministic parameter init (shapes from nn.LayerNorm(dim) + Linear).
    gamma = jnp.ones((D,), jnp.float32)   # nn.LayerNorm weight init
    beta = jnp.zeros((D,), jnp.float32)   # nn.LayerNorm bias init
    w = jax.random.normal(kw, (D, DOUT), dtype=jnp.float32) * 0.02
    b = jax.random.normal(kb, (DOUT,), dtype=jnp.float32) * 0.02

    ref = reference(x, gamma, beta, w, b)

    # 1) default (generation-aware) row tile — single tile at this small M.
    out = jax.block_until_ready(prenorm_linear(x, gamma, beta, w, b))
    assert out.shape == (B, N, DOUT), out.shape
    assert jnp.allclose(out, ref, atol=1e-4, rtol=1e-4), \
        float(jnp.max(jnp.abs(out - ref)))

    # 2) explicit small tile — exercises the multi-tile + row-padding path
    #    (M=144, tm=64 -> padded to 192, grid of 3).
    out2 = jax.block_until_ready(prenorm_linear(x, gamma, beta, w, b, tm=64))
    assert out2.shape == (B, N, DOUT), out2.shape
    assert jnp.allclose(out2, ref, atol=1e-4, rtol=1e-4), \
        float(jnp.max(jnp.abs(out2 - ref)))

    print("KERNEL_OK")
</pallas_src>

<mosaic_0001>
module attributes {stable_mosaic.version = 11 : i64} {
  func.func @prenorm_linear_kernel(%arg0: i32, %arg1: memref<144x128xf32, #tpu.memory_space<vmem>>, %arg2: memref<1x128xf32, #tpu.memory_space<vmem>>, %arg3: memref<1x128xf32, #tpu.memory_space<vmem>>, %arg4: memref<128x128xf32, #tpu.memory_space<vmem>>, %arg5: memref<1x128xf32, #tpu.memory_space<vmem>>, %arg6: memref<144x128xf32, #tpu.memory_space<vmem>>) attributes {dimension_semantics = [#tpu.dimension_semantics<parallel>], iteration_bounds = array<i64: 1>, scalar_prefetch = 0 : i64, scratch_operands = 0 : i64, tpu.core_type = #tpu.core_type<tc>, window_params = [{transform_indices = @transform_0, window_bounds = array<i64: 144, 128>}, {pipeline_mode = #tpu.pipeline_mode<synchronous>, transform_indices = @transform_1, window_bounds = array<i64: 1, 128>}, {pipeline_mode = #tpu.pipeline_mode<synchronous>, transform_indices = @transform_2, window_bounds = array<i64: 1, 128>}, {pipeline_mode = #tpu.pipeline_mode<synchronous>, transform_indices = @transform_3, window_bounds = array<i64: 128, 128>}, {pipeline_mode = #tpu.pipeline_mode<synchronous>, transform_indices = @transform_4, window_bounds = array<i64: 1, 128>}, {transform_indices = @transform_5, window_bounds = array<i64: 144, 128>}]} {
    %c0 = arith.constant 0 : index
    %c0_0 = arith.constant 0 : index
    %0 = vector.load %arg1[%c0, %c0_0] : memref<144x128xf32, #tpu.memory_space<vmem>>, vector<144x128xf32>
    %cst = arith.constant dense<0.000000e+00> : vector<144xf32>
    %1 = vector.multi_reduction <add>, %0, %cst [1] : vector<144x128xf32> to vector<144xf32>
    %2 = vector.shape_cast %1 : vector<144xf32> to vector<144x1xf32>
    %cst_1 = arith.constant 1.280000e+02 : f32
    %3 = vector.broadcast %cst_1 : f32 to vector<144x1xf32>
    %4 = arith.divf %2, %3 : vector<144x1xf32>
    %5 = vector.broadcast %4 : vector<144x1xf32> to vector<144x128xf32>
    %6 = arith.subf %0, %5 : vector<144x128xf32>
    %7 = arith.mulf %6, %6 : vector<144x128xf32>
    %cst_2 = arith.constant dense<0.000000e+00> : vector<144xf32>
    %8 = vector.multi_reduction <add>, %7, %cst_2 [1] : vector<144x128xf32> to vector<144xf32>
    %9 = vector.shape_cast %8 : vector<144xf32> to vector<144x1xf32>
    %cst_3 = arith.constant 1.280000e+02 : f32
    %10 = vector.broadcast %cst_3 : f32 to vector<144x1xf32>
    %11 = arith.divf %9, %10 : vector<144x1xf32>
    %cst_4 = arith.constant 9.99999974E-6 : f32
    %12 = vector.broadcast %cst_4 : f32 to vector<144x1xf32>
    %13 = arith.addf %11, %12 : vector<144x1xf32>
    %14 = math.rsqrt %13 : vector<144x1xf32>
    %15 = vector.broadcast %14 : vector<144x1xf32> to vector<144x128xf32>
    %16 = arith.mulf %6, %15 : vector<144x128xf32>
    %c0_5 = arith.constant 0 : index
    %c0_6 = arith.constant 0 : index
    %17 = vector.load %arg2[%c0_5, %c0_6] : memref<1x128xf32, #tpu.memory_space<vmem>>, vector<1x128xf32>
    %18 = vector.broadcast %17 : vector<1x128xf32> to vector<144x128xf32>
    %19 = arith.mulf %16, %18 : vector<144x128xf32>
    %c0_7 = arith.constant 0 : index
    %c0_8 = arith.constant 0 : index
    %20 = vector.load %arg3[%c0_7, %c0_8] : memref<1x128xf32, #tpu.memory_space<vmem>>, vector<1x128xf32>
    %21 = vector.broadcast %20 : vector<1x128xf32> to vector<144x128xf32>
    %22 = arith.addf %19, %21 : vector<144x128xf32>
    %c0_9 = arith.constant 0 : index
    %c0_10 = arith.constant 0 : index
    %23 = vector.load %arg4[%c0_9, %c0_10] : memref<128x128xf32, #tpu.memory_space<vmem>>, vector<128x128xf32>
    %cst_11 = arith.constant dense<0.000000e+00> : vector<144x128xf32>
    %24 = tpu.matmul %22, %23, %cst_11 {dimension_numbers = #tpu.dot_dimension_numbers<[1], [0], [0], [1], [0, 0, 1, 1], [], []>} : vector<144x128xf32>, vector<128x128xf32>, vector<144x128xf32> -> vector<144x128xf32>
    %c0_12 = arith.constant 0 : index
    %c0_13 = arith.constant 0 : index
    %25 = vector.load %arg5[%c0_12, %c0_13] : memref<1x128xf32, #tpu.memory_space<vmem>>, vector<1x128xf32>
    %26 = vector.broadcast %25 : vector<1x128xf32> to vector<144x128xf32>
    %27 = arith.addf %24, %26 : vector<144x128xf32>
    %c0_14 = arith.constant 0 : index
    %c0_15 = arith.constant 0 : index
    %28 = vector.load %arg6[%c0_14, %c0_15] : memref<144x128xf32, #tpu.memory_space<vmem>>, vector<144x128xf32>
    tpu.vector_store %arg6[%c0_14, %c0_15], %27 {strides = array<i32>} : memref<144x128xf32, #tpu.memory_space<vmem>>, vector<144x128xf32>,
    return
  }
  func.func @transform_0(%arg0: i32) -> (i32, i32) {
    %c0_i32 = arith.constant 0 : i32
    %c0_i32_0 = arith.constant 0 : i32
    return %arg0, %c0_i32 : i32, i32
  }
  func.func @transform_1(%arg0: i32) -> (i32, i32) {
    %c0_i32 = arith.constant 0 : i32
    %c0_i32_0 = arith.constant 0 : i32
    %c0_i32_1 = arith.constant 0 : i32
    return %c0_i32, %c0_i32_0 : i32, i32
  }
  func.func @transform_2(%arg0: i32) -> (i32, i32) {
    %c0_i32 = arith.constant 0 : i32
    %c0_i32_0 = arith.constant 0 : i32
    %c0_i32_1 = arith.constant 0 : i32
    return %c0_i32, %c0_i32_0 : i32, i32
  }
  func.func @transform_3(%arg0: i32) -> (i32, i32) {
    %c0_i32 = arith.constant 0 : i32
    %c0_i32_0 = arith.constant 0 : i32
    %c0_i32_1 = arith.constant 0 : i32
    return %c0_i32, %c0_i32_0 : i32, i32
  }
  func.func @transform_4(%arg0: i32) -> (i32, i32) {
    %c0_i32 = arith.constant 0 : i32
    %c0_i32_0 = arith.constant 0 : i32
    %c0_i32_1 = arith.constant 0 : i32
    return %c0_i32, %c0_i32_0 : i32, i32
  }
  func.func @transform_5(%arg0: i32) -> (i32, i32) {
    %c0_i32 = arith.constant 0 : i32
    %c0_i32_0 = arith.constant 0 : i32
    return %arg0, %c0_i32 : i32, i32
  }
}

</mosaic_0001>

<bundles_post_ra>
// kernel: tpu_custom_call.1
= control target key start
LH: loop header
LB: loop body
LE: loop exit
PB: predicated region body
PF: predicated region fallthrough
CT: control target
= control target key end

     0   :  { %10 = vsyncpa [#allocation3], 0  ;;  %s1058_s0 = inlined_call_operand.hbm [shape: f32[144,128], index: 0, kind: input, shape index: {}]   ;;  %s1059_s1 = inlined_call_operand.vmem [shape: f32[1,128], index: 1, kind: input, shape index: {}]   ;;  %s1060_s2 = inlined_call_operand.vmem [shape: f32[1,128], index: 2, kind: input, shape index: {}]   ;;  %s1061_s3 = inlined_call_operand.hbm [shape: f32[128,128], index: 3, kind: input, shape index: {}]   ;;  %s1062_s4 = inlined_call_operand.vmem [shape: f32[1,128], index: 4, kind: input, shape index: {}]   ;;  %s1063_s5 = inlined_call_operand.hbm [shape: f32[144,128], index: 5, kind: output, shape index: {}]  }
   0x1   :  { %11 = vsyncpa [#allocation6], 0 }
   0x2   :  { %12 = vsyncpa [#allocation4], 0  ;;  %s787_s18 = smov [#allocation2]   ;;  %s715_s22 = scalar_lea.hbm %s1058_s0, 2304 }
   0x3   :  { %s18_s19 = sshll.u32 %s787_s18, 4  ;;  %p716_p0 = scmp.ne.s32.totalorder %s1058_s0, %s715_s22  ;;  %s19_s19 = int_to_ptr.vmem [resolvable:$true] %s18_s19 }
   0x4   :  { %p719_p1 = scmp.lt.u32.totalorder %s715_s22, %s1058_s0 }
   0x6   :  { %p721_p2 = pnand %p719_p1, %p716_p0 }
   0x8   :  { %724 = shalt.err (!%p721_p2)
}
   0x9   :  { %s725_s27 = scalar_lea.vmem %s19_s19, 2304  ;;  %p730_p4 = scmp.lt.s32.totalorder %s19_s19, %s19_s19 }
   0xa   :  { %p726_p3 = scmp.ne.s32.totalorder %s19_s19, %s725_s27  ;;  %p731_p5 = scmp.lt.s32.totalorder %s725_s27, %s725_s27 }
   0xc   :  { %p732_p6 = por %p731_p5, %p730_p4 }
   0xe   :  { %p733_p7 = pnand %p732_p6, %p726_p3 }
  0x10   :  { %736 = shalt.err (!%p733_p7)
}
  0x11   :  { %s788_s28 = smov 128   ;;  %s789_s29 = smov 8  }
  0x12   :  { %24 = dma.hbm_to_vmem [thread:$0]  %s1058_s0, 2304, %s19_s19, [#allocation3], %s788_s28, %s788_s28, %s789_s29  }
  0x13   :  { %s790_s7 = smov [#allocation5]   ;;  %s737_s11 = scalar_lea.hbm %s1061_s3, 2048 }
  0x14   :  { %s34_s8 = sshll.u32 %s790_s7, 4  ;;  %p738_p8 = scmp.ne.s32.totalorder %s1061_s3, %s737_s11  ;;  %s35_s8 = int_to_ptr.vmem [resolvable:$true] %s34_s8 }
  0x15   :  { %p741_p9 = scmp.lt.u32.totalorder %s737_s11, %s1061_s3 }
  0x17   :  { %p743_p10 = pnand %p741_p9, %p738_p8 }
  0x19   :  { %746 = shalt.err (!%p743_p10)
}
  0x1a   :  { %s747_s16 = scalar_lea.vmem %s35_s8, 2048  ;;  %p752_p12 = scmp.lt.s32.totalorder %s35_s8, %s35_s8 }
  0x1b   :  { %p748_p11 = scmp.ne.s32.totalorder %s35_s8, %s747_s16  ;;  %p753_p13 = scmp.lt.s32.totalorder %s747_s16, %s747_s16 }
  0x1d   :  { %p754_p0 = por %p753_p13, %p752_p12 }
  0x1f   :  { %p755_p1 = pnand %p754_p0, %p748_p11 }
  0x21   :  { %758 = shalt.err (!%p755_p1)
}
  0x22   :  { %40 = dma.hbm_to_vmem [thread:$0]  %s1061_s3, 2048, %s35_s8, [#allocation6], %s788_s28, %s788_s28, %s789_s29  }
  0x23   :  { %781 = dma.done.wait [#allocation3], 2304  }
  0x24   :  { %782 = vsyncadd [#allocation3], 4294964992 }
  0x25   :  { %783 = dma.done.wait [#allocation6], 2048  }
  0x26   :  { %784 = vsyncadd [#allocation6], 4294965248  ;;  %v49_v0 = vld [vmem:[#allocation2] sm:$0xff]  ;;  %v51_v1 = vld [vmem:[#allocation2 + $0x10] sm:$0xff] }
  0x27   :  { %67 = vadd.xlane.f32.xlu0 %v49_v0  ;;  %71 = vadd.xlane.f32.xlu1 %v51_v1  ;;  %v50_v2 = vld [vmem:[#allocation2 + $0x8] sm:$0xff]  ;;  %v59_v3 = vld [vmem:[#allocation2 + $0x50] sm:$0xff]  ;;  %v52_v4 = vld [vmem:[#allocation2 + $0x18] sm:$0xff] }
  0x28   :  { %v852_v5 = vld [vmem:[#allocation2 + $0x58] sm:$0xff]  ;;  %v855_v6 = vld [vmem:[#allocation2 + $0x20] sm:$0xff]  ;;  %v861_v8 = vld [vmem:[#allocation2 + $0x28] sm:$0xff] }
  0x29   :  { %v857_v7 = vld [vmem:[#allocation2 + $0x60] sm:$0xff]  ;;  %v863_v9 = vld [vmem:[#allocation2 + $0x68] sm:$0xff]  ;;  %v867_v10 = vld [vmem:[#allocation2 + $0x30] sm:$0xff] }
  0x2a   :  { %v869_v11 = vld [vmem:[#allocation2 + $0x70] sm:$0xff]  ;;  %v873_v12 = vld [vmem:[#allocation2 + $0x38] sm:$0xff]  ;;  %v879_v14 = vld [vmem:[#allocation2 + $0x40] sm:$0xff] }
  0x2b   :  { %69 = vadd.xlane.f32.xlu0 %v50_v2  ;;  %87 = vadd.xlane.f32.xlu1 %v59_v3  ;;  %v875_v13 = vld [vmem:[#allocation2 + $0x78] sm:$0xff]  ;;  %v881_v15 = vld [vmem:[#allocation2 + $0x80] sm:$0xff]  ;;  %v885_v16 = vld [vmem:[#allocation2 + $0x48] sm:$0xff] }
  0x2c   :  { %v887_v17 = vld [vmem:[#allocation2 + $0x88] sm:$0xff]  ;;  %v316_v18 = vld [vmem:[#allocation5] sm:$0xff]  ;;  %v317_v19 = vld [vmem:[#allocation5 + $0x8] sm:$0xff] }
  0x2d   :  { %v318_v20 = vld [vmem:[#allocation5 + $0x10] sm:$0xff]  ;;  %v626_v21 = vpack.c.bf16 %v317_v19, %v316_v18  ;;  %v319_v22 = vld [vmem:[#allocation5 + $0x18] sm:$0xff]  ;;  %v320_v62 = vld [vmem:[#allocation5 + $0x20] sm:$0xff] }
  0x2e   :  { %v630_v23 = vpack.c.bf16 %v319_v22, %v318_v20  ;;  %v321_v63 = vld [vmem:[#allocation5 + $0x28] sm:$0xff]  ;;  %v322_v19 = vld [vmem:[#allocation5 + $0x30] sm:$0xff]  ;;  %v323_v20 = vld [vmem:[#allocation5 + $0x38] sm:$0xff] }
  0x2f   :  { %73 = vadd.xlane.f32.xlu0 %v52_v4  ;;  %89 = vadd.xlane.f32.xlu1 %v852_v5 }
  0x30   :  { %627 = vmatprep.subr.bf16.mxu0 %v626_v21  ;;  %658 = vmatprep.subr.bf16.mxu1 %v626_v21 }
  0x31   :  { %629 = vmatpush3.bf16.msra.mxu0 %v626_v21  ;;  %666 = vmatpush3.bf16.msra.mxu1 %v626_v21 }
  0x32   :  { %631 = vmatprep.subr.bf16.mxu0 %v630_v23  ;;  %659 = vmatprep.subr.bf16.mxu1 %v630_v23 }
  0x33   :  { %75 = vadd.xlane.f32.xlu0 %v855_v6  ;;  %91 = vadd.xlane.f32.xlu1 %v857_v7 }
  0x35   :  { %633 = vmatpush3.bf16.msra.mxu0 %v630_v23  ;;  %667 = vmatpush3.bf16.msra.mxu1 %v630_v23  ;;  %v638_v23 = vpack.c.bf16 %v323_v20, %v322_v19 }
  0x37   :  { %77 = vadd.xlane.f32.xlu0 %v861_v8  ;;  %93 = vadd.xlane.f32.xlu1 %v863_v9 }
  0x3b   :  { %79 = vadd.xlane.f32.xlu0 %v867_v10  ;;  %95 = vadd.xlane.f32.xlu1 %v869_v11 }
  0x3f   :  { %81 = vadd.xlane.f32.xlu0 %v873_v12  ;;  %97 = vadd.xlane.f32.xlu1 %v875_v13 }
  0x43   :  { %83 = vadd.xlane.f32.xlu0 %v879_v14  ;;  %99 = vadd.xlane.f32.xlu1 %v881_v15 }
  0x47   :  { %85 = vadd.xlane.f32.xlu0 %v885_v16  ;;  %101 = vadd.xlane.f32.xlu1 %v887_v17 }
  0xb4   :  { %v68_v24 = vpop.xlane.xlu0 %67  ;;  %v72_v25 = vpop.xlane.xlu1 %71 }
  0xb5   :  { %v104_v26 = vmul.f32 0.0078125, %v68_v24  ;;  %v106_v27 = vmul.f32 0.0078125, %v72_v25 }
  0xb7   :  { %v891_v28 = vsub.f32 %v49_v0, %v104_v26  ;;  %v893_v29 = vsub.f32 %v51_v1, %v106_v27 }
  0xb8   :  { %v70_v30 = vpop.xlane.xlu0 %69  ;;  %v88_v31 = vpop.xlane.xlu1 %87 }
  0xb9   :  { %v105_v32 = vmul.f32 0.0078125, %v70_v30  ;;  %v140_v33 = vmul.f32 %v891_v28, %v891_v28  ;;  %v114_v34 = vmul.f32 0.0078125, %v88_v31  ;;  %v142_v37 = vmul.f32 %v893_v29, %v893_v29  ;;  %v324_v30 = vld [vmem:[#allocation5 + $0x40] sm:$0xff]  ;;  %v325_v31 = vld [vmem:[#allocation5 + $0x48] sm:$0xff] }
  0xbb   :  { %v897_v35 = vsub.f32 %v50_v2, %v105_v32  ;;  %158 = vadd.xlane.f32.xlu0 %v140_v33  ;;  %v899_v36 = vsub.f32 %v59_v3, %v114_v34  ;;  %v634_v2 = vpack.c.bf16 %v321_v63, %v320_v62  ;;  %v642_v34 = vpack.c.bf16 %v325_v31, %v324_v30  ;;  %v979_v30 = vld [vmem:[%s1059_s1] ss:$0 sm:$0xff] }
  0xbc   :  { %v74_v38 = vpop.xlane.xlu0 %73  ;;  %v90_v39 = vpop.xlane.xlu1 %89 }
  0xbd   :  { %v107_v40 = vmul.f32 0.0078125, %v74_v38  ;;  %v141_v41 = vmul.f32 %v897_v35, %v897_v35  ;;  %v115_v42 = vmul.f32 0.0078125, %v90_v39  ;;  %v150_v45 = vmul.f32 %v899_v36, %v899_v36  ;;  %635 = vmatprep.subr.bf16.mxu0 %v634_v2  ;;  %660 = vmatprep.subr.bf16.mxu1 %v634_v2 }
  0xbe   :  { %637 = vmatpush3.bf16.msra.mxu0 %v634_v2  ;;  %668 = vmatpush3.bf16.msra.mxu1 %v634_v2 }
  0xbf   :  { %v905_v43 = vsub.f32 %v52_v4, %v107_v40  ;;  %162 = vadd.xlane.f32.xlu0 %v142_v37  ;;  %160 = vadd.xlane.f32.xlu1 %v141_v41  ;;  %v908_v44 = vsub.f32 %v852_v5, %v115_v42  ;;  %v326_v41 = vld [vmem:[#allocation5 + $0x50] sm:$0xff]  ;;  %v327_v42 = vld [vmem:[#allocation5 + $0x58] sm:$0xff] }
  0xc0   :  { %v76_v46 = vpop.xlane.xlu0 %75  ;;  %v92_v47 = vpop.xlane.xlu1 %91  ;;  %639 = vmatprep.subr.bf16.mxu0 %v638_v23  ;;  %661 = vmatprep.subr.bf16.mxu1 %v638_v23 }
  0xc1   :  { %v108_v48 = vmul.f32 0.0078125, %v76_v46  ;;  %v143_v49 = vmul.f32 %v905_v43, %v905_v43  ;;  %v116_v50 = vmul.f32 0.0078125, %v92_v47  ;;  %v151_v53 = vmul.f32 %v908_v44, %v908_v44 }
  0xc2   :  { %641 = vmatpush3.bf16.msra.mxu0 %v638_v23  ;;  %669 = vmatpush3.bf16.msra.mxu1 %v638_v23  ;;  %v646_v47 = vpack.c.bf16 %v327_v42, %v326_v41 }
  0xc3   :  { %v915_v51 = vsub.f32 %v855_v6, %v108_v48  ;;  %178 = vadd.xlane.f32.xlu1 %v150_v45  ;;  %164 = vadd.xlane.f32.xlu0 %v143_v49  ;;  %v918_v52 = vsub.f32 %v857_v7, %v116_v50  ;;  %v328_v50 = vld [vmem:[#allocation5 + $0x60] sm:$0xff] }
  0xc4   :  { %v78_v54 = vpop.xlane.xlu0 %77  ;;  %v94_v55 = vpop.xlane.xlu1 %93  ;;  %643 = vmatprep.subr.bf16.mxu0 %v642_v34  ;;  %662 = vmatprep.subr.bf16.mxu1 %v642_v34 }
  0xc5   :  { %v109_v56 = vmul.f32 0.0078125, %v78_v54  ;;  %v144_v57 = vmul.f32 %v915_v51, %v915_v51  ;;  %v117_v58 = vmul.f32 0.0078125, %v94_v55  ;;  %v152_v61 = vmul.f32 %v918_v52, %v918_v52 }
  0xc6   :  { %645 = vmatpush3.bf16.msra.mxu0 %v642_v34  ;;  %670 = vmatpush3.bf16.msra.mxu1 %v642_v34 }
  0xc7   :  { %v925_v59 = vsub.f32 %v861_v8, %v109_v56  ;;  %180 = vadd.xlane.f32.xlu1 %v151_v53  ;;  %166 = vadd.xlane.f32.xlu0 %v144_v57  ;;  %v928_v60 = vsub.f32 %v863_v9, %v117_v58  ;;  %v329_v53 = vld [vmem:[#allocation5 + $0x68] sm:$0xff]  ;;  %v331_v56 = vld [vmem:[#allocation5 + $0x78] sm:$0xff] }
  0xc8   :  { %v80_v0 = vpop.xlane.xlu0 %79  ;;  %v96_v1 = vpop.xlane.xlu1 %95  ;;  %647 = vmatprep.subr.bf16.mxu0 %v646_v47  ;;  %663 = vmatprep.subr.bf16.mxu1 %v646_v47  ;;  %v650_v55 = vpack.c.bf16 %v329_v53, %v328_v50 }
  0xc9   :  { %v110_v3 = vmul.f32 0.0078125, %v80_v0  ;;  %v145_v4 = vmul.f32 %v925_v59, %v925_v59  ;;  %v118_v5 = vmul.f32 0.0078125, %v96_v1  ;;  %v153_v8 = vmul.f32 %v928_v60, %v928_v60 }
  0xca   :  { %649 = vmatpush3.bf16.msra.mxu0 %v646_v47  ;;  %671 = vmatpush3.bf16.msra.mxu1 %v646_v47 }
  0xcb   :  { %v935_v6 = vsub.f32 %v867_v10, %v110_v3  ;;  %182 = vadd.xlane.f32.xlu1 %v152_v61  ;;  %168 = vadd.xlane.f32.xlu0 %v145_v4  ;;  %v938_v7 = vsub.f32 %v869_v11, %v118_v5 }
  0xcc   :  { %v82_v9 = vpop.xlane.xlu0 %81  ;;  %v98_v18 = vpop.xlane.xlu1 %97  ;;  %651 = vmatprep.subr.bf16.mxu0 %v650_v55  ;;  %664 = vmatprep.subr.bf16.mxu1 %v650_v55 }
  0xcd   :  { %v111_v21 = vmul.f32 0.0078125, %v82_v9  ;;  %v146_v22 = vmul.f32 %v935_v6, %v935_v6  ;;  %v119_v10 = vmul.f32 0.0078125, %v98_v18  ;;  %v154_v25 = vmul.f32 %v938_v7, %v938_v7 }
  0xce   :  { %653 = vmatpush3.bf16.msra.mxu0 %v650_v55  ;;  %672 = vmatpush3.bf16.msra.mxu1 %v650_v55 }
  0xcf   :  { %v945_v24 = vsub.f32 %v873_v12, %v111_v21  ;;  %184 = vadd.xlane.f32.xlu1 %v153_v8  ;;  %170 = vadd.xlane.f32.xlu0 %v146_v22  ;;  %v948_v11 = vsub.f32 %v875_v13, %v119_v10 }
  0xd0   :  { %v84_v26 = vpop.xlane.xlu0 %83  ;;  %v100_v27 = vpop.xlane.xlu1 %99 }
  0xd1   :  { %v112_v32 = vmul.f32 0.0078125, %v84_v26  ;;  %v147_v33 = vmul.f32 %v945_v24, %v945_v24  ;;  %v120_v12 = vmul.f32 0.0078125, %v100_v27  ;;  %v155_v38 = vmul.f32 %v948_v11, %v948_v11 }
  0xd3   :  { %v955_v13 = vsub.f32 %v879_v14, %v112_v32  ;;  %186 = vadd.xlane.f32.xlu1 %v154_v25  ;;  %172 = vadd.xlane.f32.xlu0 %v147_v33  ;;  %v958_v37 = vsub.f32 %v881_v15, %v120_v12 }
  0xd4   :  { %v86_v39 = vpop.xlane.xlu0 %85  ;;  %v102_v40 = vpop.xlane.xlu1 %101 }
  0xd5   :  { %v113_v45 = vmul.f32 0.0078125, %v86_v39  ;;  %v148_v46 = vmul.f32 %v955_v13, %v955_v13  ;;  %v121_v14 = vmul.f32 0.0078125, %v102_v40  ;;  %v156_v49 = vmul.f32 %v958_v37, %v958_v37 }
  0xd7   :  { %v965_v15 = vsub.f32 %v885_v16, %v113_v45  ;;  %188 = vadd.xlane.f32.xlu1 %v155_v38  ;;  %174 = vadd.xlane.f32.xlu0 %v148_v46  ;;  %v968_v48 = vsub.f32 %v887_v17, %v121_v14  ;;  %v330_v17 = vld [vmem:[#allocation5 + $0x70] sm:$0xff] }
  0xd8   :  { %v654_v57 = vpack.c.bf16 %v331_v56, %v330_v17  ;;  %v985_v38 = vld [vmem:[%s1060_s2] ss:$0 sm:$0xff] }
  0xd9   :  { %v149_v54 = vmul.f32 %v965_v15, %v965_v15  ;;  %v157_v16 = vmul.f32 %v968_v48, %v968_v48 }
  0xda   :  { %655 = vmatprep.subr.bf16.mxu0 %v654_v57  ;;  %665 = vmatprep.subr.bf16.mxu1 %v654_v57 }
  0xdb   :  { %190 = vadd.xlane.f32.xlu1 %v156_v49  ;;  %176 = vadd.xlane.f32.xlu0 %v149_v54 }
  0xdc   :  { %657 = vmatpush3.bf16.msra.mxu0 %v654_v57  ;;  %673 = vmatpush3.bf16.msra.mxu1 %v654_v57 }
  0xdf   :  { %192 = vadd.xlane.f32.xlu1 %v157_v16 }
 0x148   :  { %v159_v58 = vpop.xlane.xlu0 %158 }
 0x149   :  { %v194_v61 = vmul.f32 0.0078125, %v159_v58 }
 0x14b   :  { %v212_v62 = vadd.f32 1e-05, %v194_v61 }
 0x14c   :  { %v161_v63 = vpop.xlane.xlu1 %160  ;;  %v163_v0 = vpop.xlane.xlu0 %162 }
 0x14d   :  { %679 = vrsqrt.f32 %v212_v62  ;;  %v195_v1 = vmul.f32 0.0078125, %v161_v63  ;;  %v196_v2 = vmul.f32 0.0078125, %v163_v0 }
 0x14f   :  { %v213_v3 = vadd.f32 1e-05, %v195_v1  ;;  %v214_v4 = vadd.f32 1e-05, %v196_v2 }
 0x150   :  { %v179_v5 = vpop.xlane.xlu1 %178  ;;  %v165_v8 = vpop.xlane.xlu0 %164 }
 0x151   :  { %681 = vrsqrt.f32 %v213_v3  ;;  %v204_v9 = vmul.f32 0.0078125, %v179_v5  ;;  %v197_v18 = vmul.f32 0.0078125, %v165_v8 }
 0x152   :  { %683 = vrsqrt.f32 %v214_v4 }
 0x153   :  { %v222_v19 = vadd.f32 1e-05, %v204_v9  ;;  %v215_v20 = vadd.f32 1e-05, %v197_v18 }
 0x154   :  { %v181_v21 = vpop.xlane.xlu1 %180  ;;  %v167_v22 = vpop.xlane.xlu0 %166 }
 0x155   :  { %685 = vrsqrt.f32 %v222_v19  ;;  %v205_v10 = vmul.f32 0.0078125, %v181_v21  ;;  %v198_v23 = vmul.f32 0.0078125, %v167_v22 }
 0x156   :  { %687 = vrsqrt.f32 %v215_v20 }
 0x157   :  { %v680_v25 = vpop.eup %679  ;;  %v223_v26 = vadd.f32 1e-05, %v205_v10  ;;  %v216_v27 = vadd.f32 1e-05, %v198_v23 }
 0x158   :  { %v183_v31 = vpop.xlane.xlu1 %182  ;;  %v169_v32 = vpop.xlane.xlu0 %168  ;;  %v248_v33 = vmul.f32 %v680_v25, %v891_v28 }
 0x159   :  { %689 = vrsqrt.f32 %v223_v26  ;;  %v206_v12 = vmul.f32 0.0078125, %v183_v31  ;;  %v199_v34 = vmul.f32 0.0078125, %v169_v32 }
 0x15a   :  { %691 = vrsqrt.f32 %v216_v27  ;;  %v273_v39 = vmul.f32 %v979_v30, %v248_v33 }
 0x15b   :  { %v682_v40 = vpop.eup %681  ;;  %v224_v41 = vadd.f32 1e-05, %v206_v12  ;;  %v217_v42 = vadd.f32 1e-05, %v199_v34 }
 0x15c   :  { %v684_v45 = vpop.eup %683  ;;  %v185_v46 = vpop.xlane.xlu1 %184  ;;  %v298_v47 = vadd.f32 %v985_v38, %v273_v39  ;;  %v249_v28 = vmul.f32 %v682_v40, %v897_v35 }
 0x15d   :  { %v171_v14 = vpop.xlane.xlu0 %170  ;;  %693 = vrsqrt.f32 %v224_v41  ;;  %v207_v49 = vmul.f32 0.0078125, %v185_v46  ;;  %v250_v53 = vmul.f32 %v684_v45, %v893_v29 }
 0x15e   :  { %v200_v50 = vmul.f32 0.0078125, %v171_v14  ;;  %695 = vrsqrt.f32 %v217_v42  ;;  %599 = vmatprep.mubr.f32.mxu0 %v298_v47  ;;  %v274_v54 = vmul.f32 %v979_v30, %v249_v28 }
 0x15f   :  { %v686_v55 = vpop.eup %685  ;;  %v225_v16 = vadd.f32 1e-05, %v207_v49  ;;  %v275_v56 = vmul.f32 %v979_v30, %v250_v53 }
 0x160   :  { %v218_v17 = vadd.f32 1e-05, %v200_v50  ;;  %v688_v57 = vpop.eup %687  ;;  %v187_v58 = vpop.xlane.xlu1 %186  ;;  %v299_v62 = vadd.f32 %v985_v38, %v274_v54  ;;  %v258_v35 = vmul.f32 %v686_v55, %v899_v36 }
 0x161   :  { %v173_v61 = vpop.xlane.xlu0 %172  ;;  %697 = vrsqrt.f32 %v225_v16  ;;  %v208_v63 = vmul.f32 0.0078125, %v187_v58  ;;  %v300_v29 = vadd.f32 %v985_v38, %v275_v56  ;;  %v251_v1 = vmul.f32 %v688_v57, %v905_v43 }
 0x162   :  { %v201_v0 = vmul.f32 0.0078125, %v173_v61  ;;  %699 = vrsqrt.f32 %v218_v17  ;;  %600 = vmatmul.mubr.f32.vlgmr.msra.gmra.mrb[0].mxu0 %v299_v62  ;;  %v283_v2 = vmul.f32 %v979_v30, %v258_v35 }
 0x163   :  { %v690_v3 = vpop.eup %689  ;;  %v226_v4 = vadd.f32 1e-05, %v208_v63  ;;  %602 = vmatprep.mubr.f32.mxu0 %v300_v29  ;;  %v276_v36 = vmul.f32 %v979_v30, %v251_v1 }
 0x164   :  { %v219_v5 = vadd.f32 1e-05, %v201_v0  ;;  %v692_v8 = vpop.eup %691  ;;  %v189_v9 = vpop.xlane.xlu1 %188  ;;  %v308_v19 = vadd.f32 %v985_v38, %v283_v2  ;;  %v259_v20 = vmul.f32 %v690_v3, %v908_v44 }
 0x165   :  { %v175_v18 = vpop.xlane.xlu0 %174  ;;  %701 = vrsqrt.f32 %v226_v4  ;;  %v209_v21 = vmul.f32 0.0078125, %v189_v9  ;;  %v252_v43 = vmul.f32 %v692_v8, %v915_v51  ;;  %v301_v10 = vadd.f32 %v985_v38, %v276_v36 }
 0x166   :  { %v202_v22 = vmul.f32 0.0078125, %v175_v18  ;;  %703 = vrsqrt.f32 %v219_v5  ;;  %614 = vmatprep.mubr.f32.mxu1 %v308_v19  ;;  %v284_v23 = vmul.f32 %v979_v30, %v259_v20 }
 0x167   :  { %v694_v25 = vpop.eup %693  ;;  %v227_v26 = vadd.f32 1e-05, %v209_v21  ;;  %v277_v31 = vmul.f32 %v979_v30, %v252_v43  ;;  %603 = vmatmul.mubr.f32.gmra.mrb[2].mxu0 %v301_v10 }
 0x168   :  { %v220_v27 = vadd.f32 1e-05, %v202_v22  ;;  %v696_v32 = vpop.eup %695  ;;  %v191_v33 = vpop.xlane.xlu1 %190  ;;  %v309_v12 = vadd.f32 %v985_v38, %v284_v23  ;;  %v260_v34 = vmul.f32 %v694_v25, %v918_v52 }
 0x169   :  { %v177_v44 = vpop.xlane.xlu0 %176  ;;  %705 = vrsqrt.f32 %v227_v26  ;;  %v210_v51 = vmul.f32 0.0078125, %v191_v33  ;;  %v302_v40 = vadd.f32 %v985_v38, %v277_v31  ;;  %v253_v41 = vmul.f32 %v696_v32, %v925_v59 }
 0x16a   :  { %v203_v39 = vmul.f32 0.0078125, %v177_v44  ;;  %707 = vrsqrt.f32 %v220_v27  ;;  %615 = vmatmul.mubr.f32.vlgmr.msra.gmra.mrb[0].mxu1 %v309_v12  ;;  %v285_v42 = vmul.f32 %v979_v30, %v260_v34 }
 0x16b   :  { %v698_v45 = vpop.eup %697  ;;  %v228_v46 = vadd.f32 1e-05, %v210_v51  ;;  %605 = vmatprep.mubr.f32.mxu0 %v302_v40  ;;  %v278_v49 = vmul.f32 %v979_v30, %v253_v41 }
 0x16c   :  { %v221_v14 = vadd.f32 1e-05, %v203_v39  ;;  %v700_v47 = vpop.eup %699  ;;  %v193_v28 = vpop.xlane.xlu1 %192  ;;  %v310_v52 = vadd.f32 %v985_v38, %v285_v42  ;;  %v261_v50 = vmul.f32 %v698_v45, %v928_v60 }
 0x16d   :  { %709 = vrsqrt.f32 %v228_v46  ;;  %v211_v53 = vmul.f32 0.0078125, %v193_v28  ;;  %v254_v54 = vmul.f32 %v700_v47, %v935_v6  ;;  %v303_v59 = vadd.f32 %v985_v38, %v278_v49 }
 0x16e   :  { %711 = vrsqrt.f32 %v221_v14  ;;  %617 = vmatprep.mubr.f32.mxu1 %v310_v52  ;;  %v286_v55 = vmul.f32 %v979_v30, %v261_v50 }
 0x16f   :  { %v702_v16 = vpop.eup %701  ;;  %v229_v17 = vadd.f32 1e-05, %v211_v53  ;;  %v279_v56 = vmul.f32 %v979_v30, %v254_v54  ;;  %606 = vmatmul.mubr.f32.gmra.mrb[4].mxu0 %v303_v59 }
 0x170   :  { %v704_v57 = vpop.eup %703  ;;  %v311_v58 = vadd.f32 %v985_v38, %v286_v55  ;;  %v262_v60 = vmul.f32 %v702_v16, %v938_v7 }
 0x171   :  { %713 = vrsqrt.f32 %v229_v17  ;;  %v304_v61 = vadd.f32 %v985_v38, %v279_v56  ;;  %v255_v6 = vmul.f32 %v704_v57, %v945_v24 }
 0x172   :  { %618 = vmatmul.mubr.f32.gmra.mrb[2].mxu1 %v311_v58  ;;  %v287_v62 = vmul.f32 %v979_v30, %v262_v60 }
 0x173   :  { %v706_v35 = vpop.eup %705  ;;  %608 = vmatprep.mubr.f32.mxu0 %v304_v61  ;;  %v280_v63 = vmul.f32 %v979_v30, %v255_v6 }
 0x174   :  { %v708_v0 = vpop.eup %707  ;;  %v312_v29 = vadd.f32 %v985_v38, %v287_v62  ;;  %v263_v1 = vmul.f32 %v706_v35, %v948_v11 }
 0x175   :  { %v305_v2 = vadd.f32 %v985_v38, %v280_v63  ;;  %v256_v7 = vmul.f32 %v708_v0, %v955_v13 }
 0x176   :  { %620 = vmatprep.mubr.f32.mxu1 %v312_v29  ;;  %v288_v3 = vmul.f32 %v979_v30, %v263_v1 }
 0x177   :  { %v710_v24 = vpop.eup %709  ;;  %609 = vmatmul.mubr.f32.gmra.mrb[6].mxu0 %v305_v2  ;;  %v281_v4 = vmul.f32 %v979_v30, %v256_v7 }
 0x178   :  { %v712_v5 = vpop.eup %711  ;;  %v313_v8 = vadd.f32 %v985_v38, %v288_v3  ;;  %v264_v9 = vmul.f32 %v710_v24, %v958_v37 }
 0x179   :  { %v306_v18 = vadd.f32 %v985_v38, %v281_v4  ;;  %v257_v11 = vmul.f32 %v712_v5, %v965_v15  ;;  %v532_v15 = vld [vmem:[%s1062_s4] ss:$0 sm:$0xff]  ;;  %s791_s4 = smov [#allocation7]  }
 0x17a   :  { %621 = vmatmul.mubr.f32.gmra.mrb[4].mxu1 %v313_v8  ;;  %v289_v36 = vmul.f32 %v979_v30, %v264_v9  ;;  %s517_s21 = sshll.u32 %s791_s4, 4  ;;  %s518_s21 = int_to_ptr.vmem [resolvable:$true] %s517_s21 }
 0x17b   :  { %v714_v13 = vpop.eup %713  ;;  %611 = vmatprep.mubr.f32.mxu0 %v306_v18  ;;  %v282_v19 = vmul.f32 %v979_v30, %v257_v11  ;;  %s759_s22 = scalar_lea.vmem %s518_s21, 2304  ;;  %p764_p3 = scmp.lt.s32.totalorder %s518_s21, %s518_s21 }
 0x17c   :  { %v314_v20 = vadd.f32 %v985_v38, %v289_v36  ;;  %v265_v21 = vmul.f32 %v714_v13, %v968_v48  ;;  %p760_p2 = scmp.ne.s32.totalorder %s518_s21, %s759_s22  ;;  %p765_p4 = scmp.lt.s32.totalorder %s759_s22, %s759_s22 }
 0x17d   :  { %v307_v22 = vadd.f32 %v985_v38, %v282_v19 }
 0x17e   :  { %623 = vmatprep.mubr.f32.mxu1 %v314_v20  ;;  %v290_v37 = vmul.f32 %v979_v30, %v265_v21  ;;  %p766_p5 = por %p765_p4, %p764_p3 }
 0x17f   :  { %612 = vmatmul.mubr.f32.gmra.mrb[8].mxu0 %v307_v22 }
 0x180   :  { %v315_v43 = vadd.f32 %v985_v38, %v290_v37  ;;  %p767_p6 = pnand %p766_p5, %p760_p2 }
 0x182   :  { %624 = vmatmul.mubr.f32.gmra.mrb[6].mxu1 %v315_v43 }
 0x235   :  { %v601_v10 = vpop.f32.mrb[0].mxu0 }
 0x236   :  { %v411_v23 = vadd.f32 %v601_v10, %v532_v15  ;;  %v405_v25 = vpop.f32.mrb[1].mxu0 }
 0x237   :  { %v406_v26 = vadd.f32 %v532_v15, %v405_v25 }
 0x238   :  { %495 = vst [vmem:[#allocation7 + $0x8] sm:$0xff] %v411_v23 }
 0x239   :  { %494 = vst [vmem:[#allocation7] sm:$0xff] %v406_v26 }
 0x23a   :  { %v604_v48 = vpop.f32.mrb[2].mxu0 }
 0x23b   :  { %v421_v27 = vadd.f32 %v604_v48, %v532_v15  ;;  %v415_v31 = vpop.f32.mrb[3].mxu0 }
 0x23c   :  { %v416_v32 = vadd.f32 %v532_v15, %v415_v31 }
 0x23d   :  { %v616_v33 = vpop.f32.mrb[0].mxu1  ;;  %497 = vst [vmem:[#allocation7 + $0x18] sm:$0xff] %v421_v27 }
 0x23e   :  { %v461_v30 = vadd.f32 %v616_v33, %v532_v15  ;;  %v455_v44 = vpop.f32.mrb[1].mxu1  ;;  %496 = vst [vmem:[#allocation7 + $0x10] sm:$0xff] %v416_v32 }
 0x23f   :  { %v456_v38 = vadd.f32 %v532_v15, %v455_v44 }
 0x240   :  { %505 = vst [vmem:[#allocation7 + $0x58] sm:$0xff] %v461_v30 }
 0x241   :  { %504 = vst [vmem:[#allocation7 + $0x50] sm:$0xff] %v456_v38 }
 0x242   :  { %v607_v12 = vpop.f32.mrb[4].mxu0 }
 0x243   :  { %v431_v34 = vadd.f32 %v607_v12, %v532_v15  ;;  %v425_v51 = vpop.f32.mrb[5].mxu0 }
 0x244   :  { %v426_v39 = vadd.f32 %v532_v15, %v425_v51 }
 0x245   :  { %v619_v40 = vpop.f32.mrb[2].mxu1  ;;  %499 = vst [vmem:[#allocation7 + $0x28] sm:$0xff] %v431_v34 }
 0x246   :  { %v471_v41 = vadd.f32 %v619_v40, %v532_v15  ;;  %v465_v42 = vpop.f32.mrb[3].mxu1  ;;  %498 = vst [vmem:[#allocation7 + $0x20] sm:$0xff] %v426_v39 }
 0x247   :  { %v466_v45 = vadd.f32 %v532_v15, %v465_v42 }
 0x248   :  { %507 = vst [vmem:[#allocation7 + $0x68] sm:$0xff] %v471_v41 }
 0x249   :  { %506 = vst [vmem:[#allocation7 + $0x60] sm:$0xff] %v466_v45 }
 0x24a   :  { %v610_v46 = vpop.f32.mrb[6].mxu0 }
 0x24b   :  { %v441_v14 = vadd.f32 %v610_v46, %v532_v15  ;;  %v435_v47 = vpop.f32.mrb[7].mxu0 }
 0x24c   :  { %v436_v28 = vadd.f32 %v532_v15, %v435_v47 }
 0x24d   :  { %501 = vst [vmem:[#allocation7 + $0x38] sm:$0xff] %v441_v14  ;;  %v622_v49 = vpop.f32.mrb[4].mxu1 }
 0x24e   :  { %500 = vst [vmem:[#allocation7 + $0x30] sm:$0xff] %v436_v28  ;;  %v481_v52 = vadd.f32 %v622_v49, %v532_v15  ;;  %v475_v50 = vpop.f32.mrb[5].mxu1 }
 0x24f   :  { %v476_v53 = vadd.f32 %v532_v15, %v475_v50 }
 0x250   :  { %509 = vst [vmem:[#allocation7 + $0x78] sm:$0xff] %v481_v52 }
 0x251   :  { %508 = vst [vmem:[#allocation7 + $0x70] sm:$0xff] %v476_v53 }
 0x252   :  { %v613_v54 = vpop.f32.mrb[8].mxu0 }
 0x253   :  { %v451_v59 = vadd.f32 %v613_v54, %v532_v15  ;;  %v445_v55 = vpop.f32.mrb[9].mxu0 }
 0x254   :  { %v446_v16 = vadd.f32 %v532_v15, %v445_v55 }
 0x255   :  { %503 = vst [vmem:[#allocation7 + $0x48] sm:$0xff] %v451_v59  ;;  %v625_v17 = vpop.f32.mrb[6].mxu1 }
 0x256   :  { %502 = vst [vmem:[#allocation7 + $0x40] sm:$0xff] %v446_v16  ;;  %v491_v56 = vadd.f32 %v625_v17, %v532_v15  ;;  %v485_v57 = vpop.f32.mrb[7].mxu1 }
 0x257   :  { %v486_v58 = vadd.f32 %v532_v15, %v485_v57 }
 0x258   :  { %511 = vst [vmem:[#allocation7 + $0x88] sm:$0xff] %v491_v56 }
 0x259   :  { %510 = vst [vmem:[#allocation7 + $0x80] sm:$0xff] %v486_v58 }
 0x25a   :  { %770 = shalt.err (!%p767_p6)
}
 0x25b   :  { %s771_s25 = scalar_lea.hbm %s1063_s5, 2304 }
 0x25c   :  { %p772_p7 = scmp.ne.s32.totalorder %s1063_s5, %s771_s25  ;;  %p775_p8 = scmp.lt.u32.totalorder %s771_s25, %s1063_s5 }
 0x25e   :  { %p777_p9 = pnand %p775_p8, %p772_p7 }
 0x260   :  { %780 = shalt.err (!%p777_p9)
}
 0x261   :  { %523 = dma.vmem_to_hbm [thread:$0]  %s518_s21, 2304, %s1063_s5, [#allocation4], %s788_s28, %s788_s28, %s789_s29  }
 0x262   :  { %785 = dma.done.wait [#allocation4], 2304  }
 0x263   :  { %786 = vsyncadd [#allocation4], 4294964992 }
 0x264   :  { %527 = vsyncpa [#allocation3], 1 }
 0x265   :  { %528 = vsyncpa [#allocation6], 1 }
 0x266   :  { %529 = vsyncpa [#allocation4], 1 }

</bundles_post_ra>
